<compile_context>
chip_gen: v6e
topology: v6e:2x2x1
jax: 0.10.0
libtpu: 0.0.40
codegen_flags: <defaults>
</compile_context>

<pallas_src>
import jax
import jax.numpy as jnp
import numpy as np
from jax import lax
from jax.experimental import pallas as pl
from jax.experimental.pallas import tpu as pltpu


# ----------------------------- Pallas kernel ------------------------------ #
def _decoder_kernel(x_ref, h0_ref, c0_ref, w_ih_ref, w_hh_ref, b_ref,
                    w_out_ref, b_out_ref,
                    pred_ref, h_out_ref, c_out_ref,
                    gx_sc, hs_sc):
    B, H = h0_ref.shape
    TB = x_ref.shape[0]
    T = TB // B

    x = x_ref[...].astype(jnp.float32)                       # (T*B, D)

    # ---- Phase 1: fused input projection, hoisted off the serial path ----
    # One (T*B, D) @ (D, 4H) matmul; bias broadcast happens once here.
    gx_sc[...] = (jnp.dot(x, w_ih_ref[...], preferred_element_type=jnp.float32)
                  + b_ref[...])                               # (T*B, 4H)

    # Hoist recurrent weight load out of the loop.
    w_hh = w_hh_ref[...].astype(jnp.float32)                  # (H, 4H)

    h0 = h0_ref[...].astype(jnp.float32)
    c0 = c0_ref[...].astype(jnp.float32)

    # ---- Phase 2: serial recurrence — one MXU push per step --------------
    def step(t, carry):
        h_prev, c_prev = carry
        off = pl.multiple_of(t * B, B)
        gates = gx_sc[pl.ds(off, B), :] + jnp.dot(
            h_prev, w_hh, preferred_element_type=jnp.float32)  # (B, 4H)
        # PyTorch gate order: i, f, g, o (static lane slices of the fused tile).
        i_g = jax.nn.sigmoid(gates[:, 0 * H:1 * H])
        f_g = jax.nn.sigmoid(gates[:, 1 * H:2 * H])
        g_g = jnp.tanh(gates[:, 2 * H:3 * H])
        o_g = jax.nn.sigmoid(gates[:, 3 * H:4 * H])
        c_new = f_g * c_prev + i_g * g_g
        h_new = o_g * jnp.tanh(c_new)
        hs_sc[pl.ds(off, B), :] = h_new                        # collect h_t
        return (h_new, c_new)

    h_last, c_last = lax.fori_loop(0, T, step, (h0, c0), unroll=(T <= 32))

    # ---- Phase 3: batched output projection, hoisted ----------------------
    pred = (jnp.dot(hs_sc[...], w_out_ref[...], preferred_element_type=jnp.float32)
            + b_out_ref[...])                                  # (T*B, D)
    pred_ref[...] = pred.astype(pred_ref.dtype)

    # Final hidden / cell state, written exactly once.
    h_out_ref[...] = h_last.astype(h_out_ref.dtype)
    c_out_ref[...] = c_last.astype(c_out_ref.dtype)


# ------------------------------- Wrapper ---------------------------------- #
def decoder_forward(x_btd, hidden_lbh, cell_lbh, params):
    """Mirrors Decoder.forward(x, hidden, cell) with batch_first semantics."""
    B, T, D = x_btd.shape
    H = params["w_hh"].shape[0]
    assert hidden_lbh.shape == (1, B, H) and cell_lbh.shape == (1, B, H)

    # Time-major, flattened (T*B, D) layout for the kernel (cheap XLA reshape).
    x_flat = jnp.transpose(x_btd, (1, 0, 2)).reshape(T * B, D)
    h0 = hidden_lbh[0]
    c0 = cell_lbh[0]

    vmem = pltpu.MemorySpace.VMEM
    pred_flat, h_last, c_last = pl.pallas_call(
        _decoder_kernel,
        out_shape=(
            jax.ShapeDtypeStruct((T * B, D), x_btd.dtype),
            jax.ShapeDtypeStruct((B, H), hidden_lbh.dtype),
            jax.ShapeDtypeStruct((B, H), cell_lbh.dtype),
        ),
        in_specs=[pl.BlockSpec(memory_space=vmem)] * 8,
        out_specs=(
            pl.BlockSpec(memory_space=vmem),
            pl.BlockSpec(memory_space=vmem),
            pl.BlockSpec(memory_space=vmem),
        ),
        scratch_shapes=[
            pltpu.VMEM((T * B, 4 * H), jnp.float32),   # fused input-gate slab
            pltpu.VMEM((T * B, H), jnp.float32),       # collected h_t slab
        ],
    )(x_flat, h0, c0, params["w_ih"], params["w_hh"], params["b"],
      params["w_out"], params["b_out"])

    predictions = jnp.transpose(pred_flat.reshape(T, B, D), (1, 0, 2))  # (B, T, D)
    return predictions, h_last[None], c_last[None]


# --------------------------- Parameter init -------------------------------- #
def init_params(key, output_dim, hidden_dim):
    """Uniform(-1/sqrt(H), 1/sqrt(H)) init (like nn.LSTM / nn.Linear).
    Fused-gate layout: w_ih (D, 4H), w_hh (H, 4H), combined bias (1, 4H),
    gate order i, f, g, o along the last axis (PyTorch convention)."""
    D, H = output_dim, hidden_dim
    k = 1.0 / np.sqrt(H)
    keys = jax.random.split(key, 6)
    w_ih = jax.random.uniform(keys[0], (D, 4 * H), jnp.float32, -k, k)   # W_ih^T fused
    w_hh = jax.random.uniform(keys[1], (H, 4 * H), jnp.float32, -k, k)   # W_hh^T fused
    b_ih = jax.random.uniform(keys[2], (1, 4 * H), jnp.float32, -k, k)
    b_hh = jax.random.uniform(keys[3], (1, 4 * H), jnp.float32, -k, k)
    w_out = jax.random.uniform(keys[4], (H, D), jnp.float32, -k, k)      # W_fc^T
    b_out = jax.random.uniform(keys[5], (1, D), jnp.float32, -k, k)
    return {"w_ih": w_ih, "w_hh": w_hh, "b": b_ih + b_hh,
            "w_out": w_out, "b_out": b_out}


# -------------------------- Pure-JAX reference ----------------------------- #
def decoder_reference(x_btd, hidden_lbh, cell_lbh, params):
    w_ih, w_hh, b = params["w_ih"], params["w_hh"], params["b"]
    H = w_hh.shape[0]

    def step(carry, xt):
        h, c = carry
        gates = xt @ w_ih + h @ w_hh + b
        i = jax.nn.sigmoid(gates[:, 0 * H:1 * H])
        f = jax.nn.sigmoid(gates[:, 1 * H:2 * H])
        g = jnp.tanh(gates[:, 2 * H:3 * H])
        o = jax.nn.sigmoid(gates[:, 3 * H:4 * H])
        c_new = f * c + i * g
        h_new = o * jnp.tanh(c_new)
        pred = h_new @ params["w_out"] + params["b_out"]
        return (h_new, c_new), pred

    x_tbd = jnp.transpose(x_btd, (1, 0, 2))
    (h_last, c_last), preds = lax.scan(step, (hidden_lbh[0], cell_lbh[0]), x_tbd)
    return jnp.transpose(preds, (1, 0, 2)), h_last[None], c_last[None]


# --------------------------------- Main ------------------------------------ #
if __name__ == "__main__":
    B, T, D, H = 2, 8, 4, 32        # batch, seq, output_dim, hidden_dim

    root = jax.random.PRNGKey(0)
    kx, kh, kc, kp = jax.random.split(root, 4)

    x = jax.random.normal(kx, (B, T, D), jnp.float32)
    hidden = jax.random.normal(kh, (1, B, H), jnp.float32)
    cell = jax.random.normal(kc, (1, B, H), jnp.float32)
    params = init_params(kp, D, H)

    pred, h_out, c_out = decoder_forward(x, hidden, cell, params)
    jax.block_until_ready((pred, h_out, c_out))

    pred_ref, h_ref, c_ref = decoder_reference(x, hidden, cell, params)
    np.testing.assert_allclose(np.asarray(pred), np.asarray(pred_ref),
                               rtol=1e-5, atol=1e-5)
    np.testing.assert_allclose(np.asarray(h_out), np.asarray(h_ref),
                               rtol=1e-5, atol=1e-5)
    np.testing.assert_allclose(np.asarray(c_out), np.asarray(c_ref),
                               rtol=1e-5, atol=1e-5)

    print("KERNEL_OK")
</pallas_src>

<mosaic_0001>
module attributes {stable_mosaic.version = 11 : i64} {
  func.func @_decoder_kernel(%arg0: memref<16x4xf32, #tpu.memory_space<vmem>>, %arg1: memref<2x32xf32, #tpu.memory_space<vmem>>, %arg2: memref<2x32xf32, #tpu.memory_space<vmem>>, %arg3: memref<4x128xf32, #tpu.memory_space<vmem>>, %arg4: memref<32x128xf32, #tpu.memory_space<vmem>>, %arg5: memref<1x128xf32, #tpu.memory_space<vmem>>, %arg6: memref<32x4xf32, #tpu.memory_space<vmem>>, %arg7: memref<1x4xf32, #tpu.memory_space<vmem>>, %arg8: memref<16x4xf32, #tpu.memory_space<vmem>>, %arg9: memref<2x32xf32, #tpu.memory_space<vmem>>, %arg10: memref<2x32xf32, #tpu.memory_space<vmem>>, %arg11: memref<16x128xf32, #tpu.memory_space<vmem>>, %arg12: memref<16x32xf32, #tpu.memory_space<vmem>>) attributes {dimension_semantics = [], scalar_prefetch = 0 : i64, scratch_operands = 2 : i64, tpu.core_type = #tpu.core_type<tc>} {
    %c0 = arith.constant 0 : index
    %c0_0 = arith.constant 0 : index
    %0 = vector.load %arg0[%c0, %c0_0] : memref<16x4xf32, #tpu.memory_space<vmem>>, vector<16x4xf32>
    %c0_1 = arith.constant 0 : index
    %c0_2 = arith.constant 0 : index
    %1 = vector.load %arg3[%c0_1, %c0_2] : memref<4x128xf32, #tpu.memory_space<vmem>>, vector<4x128xf32>
    %cst = arith.constant dense<0.000000e+00> : vector<16x128xf32>
    %2 = tpu.matmul %0, %1, %cst {dimension_numbers = #tpu.dot_dimension_numbers<[1], [0], [0], [1], [0, 0, 1, 1], [], []>} : vector<16x4xf32>, vector<4x128xf32>, vector<16x128xf32> -> vector<16x128xf32>
    %c0_3 = arith.constant 0 : index
    %c0_4 = arith.constant 0 : index
    %3 = vector.load %arg5[%c0_3, %c0_4] : memref<1x128xf32, #tpu.memory_space<vmem>>, vector<1x128xf32>
    %4 = vector.broadcast %3 : vector<1x128xf32> to vector<16x128xf32>
    %5 = arith.addf %2, %4 : vector<16x128xf32>
    %c0_5 = arith.constant 0 : index
    %c0_6 = arith.constant 0 : index
    %6 = vector.load %arg11[%c0_5, %c0_6] : memref<16x128xf32, #tpu.memory_space<vmem>>, vector<16x128xf32>
    tpu.vector_store %arg11[%c0_5, %c0_6], %5 {strides = array<i32>} : memref<16x128xf32, #tpu.memory_space<vmem>>, vector<16x128xf32>,
    %c0_7 = arith.constant 0 : index
    %c0_8 = arith.constant 0 : index
    %7 = vector.load %arg4[%c0_7, %c0_8] : memref<32x128xf32, #tpu.memory_space<vmem>>, vector<32x128xf32>
    %c0_9 = arith.constant 0 : index
    %c0_10 = arith.constant 0 : index
    %8 = vector.load %arg1[%c0_9, %c0_10] : memref<2x32xf32, #tpu.memory_space<vmem>>, vector<2x32xf32>
    %c0_11 = arith.constant 0 : index
    %c0_12 = arith.constant 0 : index
    %9 = vector.load %arg2[%c0_11, %c0_12] : memref<2x32xf32, #tpu.memory_space<vmem>>, vector<2x32xf32>
    %c0_i32 = arith.constant 0 : i32
    %c2_i32 = arith.constant 2 : i32
    %10 = arith.muli %c0_i32, %c2_i32 : i32
    %11 = tpu.assume_multiple %10, 2 : i32
    %12 = arith.index_cast %11 : i32 to index
    %c0_13 = arith.constant 0 : index
    %13 = vector.load %arg11[%12, %c0_13] : memref<16x128xf32, #tpu.memory_space<vmem>>, vector<2x128xf32>
    %cst_14 = arith.constant dense<0.000000e+00> : vector<2x128xf32>
    %14 = tpu.matmul %8, %7, %cst_14 {dimension_numbers = #tpu.dot_dimension_numbers<[1], [0], [0], [1], [0, 0, 1, 1], [], []>} : vector<2x32xf32>, vector<32x128xf32>, vector<2x128xf32> -> vector<2x128xf32>
    %15 = arith.addf %13, %14 : vector<2x128xf32>
    %16 = vector.extract_strided_slice %15 {offsets = [0, 0], sizes = [2, 32], strides = [1, 1]} : vector<2x128xf32> to vector<2x32xf32>
    %17 = arith.negf %16 : vector<2x32xf32>
    %18 = math.exp %17 : vector<2x32xf32>
    %cst_15 = arith.constant 1.000000e+00 : f32
    %19 = vector.broadcast %cst_15 : f32 to vector<2x32xf32>
    %20 = arith.addf %19, %18 : vector<2x32xf32>
    %21 = arith.divf %19, %20 : vector<2x32xf32>
    %22 = vector.extract_strided_slice %15 {offsets = [0, 32], sizes = [2, 32], strides = [1, 1]} : vector<2x128xf32> to vector<2x32xf32>
    %23 = arith.negf %22 : vector<2x32xf32>
    %24 = math.exp %23 : vector<2x32xf32>
    %cst_16 = arith.constant 1.000000e+00 : f32
    %25 = vector.broadcast %cst_16 : f32 to vector<2x32xf32>
    %26 = arith.addf %25, %24 : vector<2x32xf32>
    %27 = arith.divf %25, %26 : vector<2x32xf32>
    %28 = vector.extract_strided_slice %15 {offsets = [0, 64], sizes = [2, 32], strides = [1, 1]} : vector<2x128xf32> to vector<2x32xf32>
    %29 = math.tanh %28 : vector<2x32xf32>
    %30 = vector.extract_strided_slice %15 {offsets = [0, 96], sizes = [2, 32], strides = [1, 1]} : vector<2x128xf32> to vector<2x32xf32>
    %31 = arith.negf %30 : vector<2x32xf32>
    %32 = math.exp %31 : vector<2x32xf32>
    %cst_17 = arith.constant 1.000000e+00 : f32
    %33 = vector.broadcast %cst_17 : f32 to vector<2x32xf32>
    %34 = arith.addf %33, %32 : vector<2x32xf32>
    %35 = arith.divf %33, %34 : vector<2x32xf32>
    %36 = arith.mulf %27, %9 : vector<2x32xf32>
    %37 = arith.mulf %21, %29 : vector<2x32xf32>
    %38 = arith.addf %36, %37 : vector<2x32xf32>
    %39 = math.tanh %38 : vector<2x32xf32>
    %40 = arith.mulf %35, %39 : vector<2x32xf32>
    %41 = arith.index_cast %11 : i32 to index
    %c0_18 = arith.constant 0 : index
    %42 = vector.load %arg12[%41, %c0_18] : memref<16x32xf32, #tpu.memory_space<vmem>>, vector<2x32xf32>
    tpu.vector_store %arg12[%41, %c0_18], %40 {strides = array<i32>} : memref<16x32xf32, #tpu.memory_space<vmem>>, vector<2x32xf32>,
    %c1_i32 = arith.constant 1 : i32
    %c2_i32_19 = arith.constant 2 : i32
    %43 = arith.muli %c1_i32, %c2_i32_19 : i32
    %44 = tpu.assume_multiple %43, 2 : i32
    %45 = arith.index_cast %44 : i32 to index
    %c0_20 = arith.constant 0 : index
    %46 = vector.load %arg11[%45, %c0_20] : memref<16x128xf32, #tpu.memory_space<vmem>>, vector<2x128xf32>
    %cst_21 = arith.constant dense<0.000000e+00> : vector<2x128xf32>
    %47 = tpu.matmul %40, %7, %cst_21 {dimension_numbers = #tpu.dot_dimension_numbers<[1], [0], [0], [1], [0, 0, 1, 1], [], []>} : vector<2x32xf32>, vector<32x128xf32>, vector<2x128xf32> -> vector<2x128xf32>
    %48 = arith.addf %46, %47 : vector<2x128xf32>
    %49 = vector.extract_strided_slice %48 {offsets = [0, 0], sizes = [2, 32], strides = [1, 1]} : vector<2x128xf32> to vector<2x32xf32>
    %50 = arith.negf %49 : vector<2x32xf32>
    %51 = math.exp %50 : vector<2x32xf32>
    %cst_22 = arith.constant 1.000000e+00 : f32
    %52 = vector.broadcast %cst_22 : f32 to vector<2x32xf32>
    %53 = arith.addf %52, %51 : vector<2x32xf32>
    %54 = arith.divf %52, %53 : vector<2x32xf32>
    %55 = vector.extract_strided_slice %48 {offsets = [0, 32], sizes = [2, 32], strides = [1, 1]} : vector<2x128xf32> to vector<2x32xf32>
    %56 = arith.negf %55 : vector<2x32xf32>
    %57 = math.exp %56 : vector<2x32xf32>
    %cst_23 = arith.constant 1.000000e+00 : f32
    %58 = vector.broadcast %cst_23 : f32 to vector<2x32xf32>
    %59 = arith.addf %58, %57 : vector<2x32xf32>
    %60 = arith.divf %58, %59 : vector<2x32xf32>
    %61 = vector.extract_strided_slice %48 {offsets = [0, 64], sizes = [2, 32], strides = [1, 1]} : vector<2x128xf32> to vector<2x32xf32>
    %62 = math.tanh %61 : vector<2x32xf32>
    %63 = vector.extract_strided_slice %48 {offsets = [0, 96], sizes = [2, 32], strides = [1, 1]} : vector<2x128xf32> to vector<2x32xf32>
    %64 = arith.negf %63 : vector<2x32xf32>
    %65 = math.exp %64 : vector<2x32xf32>
    %cst_24 = arith.constant 1.000000e+00 : f32
    %66 = vector.broadcast %cst_24 : f32 to vector<2x32xf32>
    %67 = arith.addf %66, %65 : vector<2x32xf32>
    %68 = arith.divf %66, %67 : vector<2x32xf32>
    %69 = arith.mulf %60, %38 : vector<2x32xf32>
    %70 = arith.mulf %54, %62 : vector<2x32xf32>
    %71 = arith.addf %69, %70 : vector<2x32xf32>
    %72 = math.tanh %71 : vector<2x32xf32>
    %73 = arith.mulf %68, %72 : vector<2x32xf32>
    %74 = arith.index_cast %44 : i32 to index
    %c0_25 = arith.constant 0 : index
    %75 = vector.load %arg12[%74, %c0_25] : memref<16x32xf32, #tpu.memory_space<vmem>>, vector<2x32xf32>
    tpu.vector_store %arg12[%74, %c0_25], %73 {strides = array<i32>} : memref<16x32xf32, #tpu.memory_space<vmem>>, vector<2x32xf32>,
    %c2_i32_26 = arith.constant 2 : i32
    %c2_i32_27 = arith.constant 2 : i32
    %76 = arith.muli %c2_i32_26, %c2_i32_27 : i32
    %77 = tpu.assume_multiple %76, 2 : i32
    %78 = arith.index_cast %77 : i32 to index
    %c0_28 = arith.constant 0 : index
    %79 = vector.load %arg11[%78, %c0_28] : memref<16x128xf32, #tpu.memory_space<vmem>>, vector<2x128xf32>
    %cst_29 = arith.constant dense<0.000000e+00> : vector<2x128xf32>
    %80 = tpu.matmul %73, %7, %cst_29 {dimension_numbers = #tpu.dot_dimension_numbers<[1], [0], [0], [1], [0, 0, 1, 1], [], []>} : vector<2x32xf32>, vector<32x128xf32>, vector<2x128xf32> -> vector<2x128xf32>
    %81 = arith.addf %79, %80 : vector<2x128xf32>
    %82 = vector.extract_strided_slice %81 {offsets = [0, 0], sizes = [2, 32], strides = [1, 1]} : vector<2x128xf32> to vector<2x32xf32>
    %83 = arith.negf %82 : vector<2x32xf32>
    %84 = math.exp %83 : vector<2x32xf32>
    %cst_30 = arith.constant 1.000000e+00 : f32
    %85 = vector.broadcast %cst_30 : f32 to vector<2x32xf32>
    %86 = arith.addf %85, %84 : vector<2x32xf32>
    %87 = arith.divf %85, %86 : vector<2x32xf32>
    %88 = vector.extract_strided_slice %81 {offsets = [0, 32], sizes = [2, 32], strides = [1, 1]} : vector<2x128xf32> to vector<2x32xf32>
    %89 = arith.negf %88 : vector<2x32xf32>
    %90 = math.exp %89 : vector<2x32xf32>
    %cst_31 = arith.constant 1.000000e+00 : f32
    %91 = vector.broadcast %cst_31 : f32 to vector<2x32xf32>
    %92 = arith.addf %91, %90 : vector<2x32xf32>
    %93 = arith.divf %91, %92 : vector<2x32xf32>
    %94 = vector.extract_strided_slice %81 {offsets = [0, 64], sizes = [2, 32], strides = [1, 1]} : vector<2x128xf32> to vector<2x32xf32>
    %95 = math.tanh %94 : vector<2x32xf32>
    %96 = vector.extract_strided_slice %81 {offsets = [0, 96], sizes = [2, 32], strides = [1, 1]} : vector<2x128xf32> to vector<2x32xf32>
    %97 = arith.negf %96 : vector<2x32xf32>
    %98 = math.exp %97 : vector<2x32xf32>
    %cst_32 = arith.constant 1.000000e+00 : f32
    %99 = vector.broadcast %cst_32 : f32 to vector<2x32xf32>
    %100 = arith.addf %99, %98 : vector<2x32xf32>
    %101 = arith.divf %99, %100 : vector<2x32xf32>
    %102 = arith.mulf %93, %71 : vector<2x32xf32>
    %103 = arith.mulf %87, %95 : vector<2x32xf32>
    %104 = arith.addf %102, %103 : vector<2x32xf32>
    %105 = math.tanh %104 : vector<2x32xf32>
    %106 = arith.mulf %101, %105 : vector<2x32xf32>
    %107 = arith.index_cast %77 : i32 to index
    %c0_33 = arith.constant 0 : index
    %108 = vector.load %arg12[%107, %c0_33] : memref<16x32xf32, #tpu.memory_space<vmem>>, vector<2x32xf32>
    tpu.vector_store %arg12[%107, %c0_33], %106 {strides = array<i32>} : memref<16x32xf32, #tpu.memory_space<vmem>>, vector<2x32xf32>,
    %c3_i32 = arith.constant 3 : i32
    %c2_i32_34 = arith.constant 2 : i32
    %109 = arith.muli %c3_i32, %c2_i32_34 : i32
    %110 = tpu.assume_multiple %109, 2 : i32
    %111 = arith.index_cast %110 : i32 to index
    %c0_35 = arith.constant 0 : index
    %112 = vector.load %arg11[%111, %c0_35] : memref<16x128xf32, #tpu.memory_space<vmem>>, vector<2x128xf32>
    %cst_36 = arith.constant dense<0.000000e+00> : vector<2x128xf32>
    %113 = tpu.matmul %106, %7, %cst_36 {dimension_numbers = #tpu.dot_dimension_numbers<[1], [0], [0], [1], [0, 0, 1, 1], [], []>} : vector<2x32xf32>, vector<32x128xf32>, vector<2x128xf32> -> vector<2x128xf32>
    %114 = arith.addf %112, %113 : vector<2x128xf32>
    %115 = vector.extract_strided_slice %114 {offsets = [0, 0], sizes = [2, 32], strides = [1, 1]} : vector<2x128xf32> to vector<2x32xf32>
    %116 = arith.negf %115 : vector<2x32xf32>
    %117 = math.exp %116 : vector<2x32xf32>
    %cst_37 = arith.constant 1.000000e+00 : f32
    %118 = vector.broadcast %cst_37 : f32 to vector<2x32xf32>
    %119 = arith.addf %118, %117 : vector<2x32xf32>
    %120 = arith.divf %118, %119 : vector<2x32xf32>
    %121 = vector.extract_strided_slice %114 {offsets = [0, 32], sizes = [2, 32], strides = [1, 1]} : vector<2x128xf32> to vector<2x32xf32>
    %122 = arith.negf %121 : vector<2x32xf32>
    %123 = math.exp %122 : vector<2x32xf32>
    %cst_38 = arith.constant 1.000000e+00 : f32
    %124 = vector.broadcast %cst_38 : f32 to vector<2x32xf32>
    %125 = arith.addf %124, %123 : vector<2x32xf32>
    %126 = arith.divf %124, %125 : vector<2x32xf32>
    %127 = vector.extract_strided_slice %114 {offsets = [0, 64], sizes = [2, 32], strides = [1, 1]} : vector<2x128xf32> to vector<2x32xf32>
    %128 = math.tanh %127 : vector<2x32xf32>
    %129 = vector.extract_strided_slice %114 {offsets = [0, 96], sizes = [2, 32], strides = [1, 1]} : vector<2x128xf32> to vector<2x32xf32>
    %130 = arith.negf %129 : vector<2x32xf32>
    %131 = math.exp %130 : vector<2x32xf32>
    %cst_39 = arith.constant 1.000000e+00 : f32
    %132 = vector.broadcast %cst_39 : f32 to vector<2x32xf32>
    %133 = arith.addf %132, %131 : vector<2x32xf32>
    %134 = arith.divf %132, %133 : vector<2x32xf32>
    %135 = arith.mulf %126, %104 : vector<2x32xf32>
    %136 = arith.mulf %120, %128 : vector<2x32xf32>
    %137 = arith.addf %135, %136 : vector<2x32xf32>
    %138 = math.tanh %137 : vector<2x32xf32>
    %139 = arith.mulf %134, %138 : vector<2x32xf32>
    %140 = arith.index_cast %110 : i32 to index
    %c0_40 = arith.constant 0 : index
    %141 = vector.load %arg12[%140, %c0_40] : memref<16x32xf32, #tpu.memory_space<vmem>>, vector<2x32xf32>
    tpu.vector_store %arg12[%140, %c0_40], %139 {strides = array<i32>} : memref<16x32xf32, #tpu.memory_space<vmem>>, vector<2x32xf32>,
    %c4_i32 = arith.constant 4 : i32
    %c2_i32_41 = arith.constant 2 : i32
    %142 = arith.muli %c4_i32, %c2_i32_41 : i32
    %143 = tpu.assume_multiple %142, 2 : i32
    %144 = arith.index_cast %143 : i32 to index
    %c0_42 = arith.constant 0 : index
    %145 = vector.load %arg11[%144, %c0_42] : memref<16x128xf32, #tpu.memory_space<vmem>>, vector<2x128xf32>
    %cst_43 = arith.constant dense<0.000000e+00> : vector<2x128xf32>
    %146 = tpu.matmul %139, %7, %cst_43 {dimension_numbers = #tpu.dot_dimension_numbers<[1], [0], [0], [1], [0, 0, 1, 1], [], []>} : vector<2x32xf32>, vector<32x128xf32>, vector<2x128xf32> -> vector<2x128xf32>
    %147 = arith.addf %145, %146 : vector<2x128xf32>
    %148 = vector.extract_strided_slice %147 {offsets = [0, 0], sizes = [2, 32], strides = [1, 1]} : vector<2x128xf32> to vector<2x32xf32>
    %149 = arith.negf %148 : vector<2x32xf32>
    %150 = math.exp %149 : vector<2x32xf32>
    %cst_44 = arith.constant 1.000000e+00 : f32
    %151 = vector.broadcast %cst_44 : f32 to vector<2x32xf32>
    %152 = arith.addf %151, %150 : vector<2x32xf32>
    %153 = arith.divf %151, %152 : vector<2x32xf32>
    %154 = vector.extract_strided_slice %147 {offsets = [0, 32], sizes = [2, 32], strides = [1, 1]} : vector<2x128xf32> to vector<2x32xf32>
    %155 = arith.negf %154 : vector<2x32xf32>
    %156 = math.exp %155 : vector<2x32xf32>
    %cst_45 = arith.constant 1.000000e+00 : f32
    %157 = vector.broadcast %cst_45 : f32 to vector<2x32xf32>
    %158 = arith.addf %157, %156 : vector<2x32xf32>
    %159 = arith.divf %157, %158 : vector<2x32xf32>
    %160 = vector.extract_strided_slice %147 {offsets = [0, 64], sizes = [2, 32], strides = [1, 1]} : vector<2x128xf32> to vector<2x32xf32>
    %161 = math.tanh %160 : vector<2x32xf32>
    %162 = vector.extract_strided_slice %147 {offsets = [0, 96], sizes = [2, 32], strides = [1, 1]} : vector<2x128xf32> to vector<2x32xf32>
    %163 = arith.negf %162 : vector<2x32xf32>
    %164 = math.exp %163 : vector<2x32xf32>
    %cst_46 = arith.constant 1.000000e+00 : f32
    %165 = vector.broadcast %cst_46 : f32 to vector<2x32xf32>
    %166 = arith.addf %165, %164 : vector<2x32xf32>
    %167 = arith.divf %165, %166 : vector<2x32xf32>
    %168 = arith.mulf %159, %137 : vector<2x32xf32>
    %169 = arith.mulf %153, %161 : vector<2x32xf32>
    %170 = arith.addf %168, %169 : vector<2x32xf32>
    %171 = math.tanh %170 : vector<2x32xf32>
    %172 = arith.mulf %167, %171 : vector<2x32xf32>
    %173 = arith.index_cast %143 : i32 to index
    %c0_47 = arith.constant 0 : index
    %174 = vector.load %arg12[%173, %c0_47] : memref<16x32xf32, #tpu.memory_space<vmem>>, vector<2x32xf32>
    tpu.vector_store %arg12[%173, %c0_47], %172 {strides = array<i32>} : memref<16x32xf32, #tpu.memory_space<vmem>>, vector<2x32xf32>,
    %c5_i32 = arith.constant 5 : i32
    %c2_i32_48 = arith.constant 2 : i32
    %175 = arith.muli %c5_i32, %c2_i32_48 : i32
    %176 = tpu.assume_multiple %175, 2 : i32
    %177 = arith.index_cast %176 : i32 to index
    %c0_49 = arith.constant 0 : index
    %178 = vector.load %arg11[%177, %c0_49] : memref<16x128xf32, #tpu.memory_space<vmem>>, vector<2x128xf32>
    %cst_50 = arith.constant dense<0.000000e+00> : vector<2x128xf32>
    %179 = tpu.matmul %172, %7, %cst_50 {dimension_numbers = #tpu.dot_dimension_numbers<[1], [0], [0], [1], [0, 0, 1, 1], [], []>} : vector<2x32xf32>, vector<32x128xf32>, vector<2x128xf32> -> vector<2x128xf32>
    %180 = arith.addf %178, %179 : vector<2x128xf32>
    %181 = vector.extract_strided_slice %180 {offsets = [0, 0], sizes = [2, 32], strides = [1, 1]} : vector<2x128xf32> to vector<2x32xf32>
    %182 = arith.negf %181 : vector<2x32xf32>
    %183 = math.exp %182 : vector<2x32xf32>
    %cst_51 = arith.constant 1.000000e+00 : f32
    %184 = vector.broadcast %cst_51 : f32 to vector<2x32xf32>
    %185 = arith.addf %184, %183 : vector<2x32xf32>
    %186 = arith.divf %184, %185 : vector<2x32xf32>
    %187 = vector.extract_strided_slice %180 {offsets = [0, 32], sizes = [2, 32], strides = [1, 1]} : vector<2x128xf32> to vector<2x32xf32>
    %188 = arith.negf %187 : vector<2x32xf32>
    %189 = math.exp %188 : vector<2x32xf32>
    %cst_52 = arith.constant 1.000000e+00 : f32
    %190 = vector.broadcast %cst_52 : f32 to vector<2x32xf32>
    %191 = arith.addf %190, %189 : vector<2x32xf32>
    %192 = arith.divf %190, %191 : vector<2x32xf32>
    %193 = vector.extract_strided_slice %180 {offsets = [0, 64], sizes = [2, 32], strides = [1, 1]} : vector<2x128xf32> to vector<2x32xf32>
    %194 = math.tanh %193 : vector<2x32xf32>
    %195 = vector.extract_strided_slice %180 {offsets = [0, 96], sizes = [2, 32], strides = [1, 1]} : vector<2x128xf32> to vector<2x32xf32>
    %196 = arith.negf %195 : vector<2x32xf32>
    %197 = math.exp %196 : vector<2x32xf32>
    %cst_53 = arith.constant 1.000000e+00 : f32
    %198 = vector.broadcast %cst_53 : f32 to vector<2x32xf32>
    %199 = arith.addf %198, %197 : vector<2x32xf32>
    %200 = arith.divf %198, %199 : vector<2x32xf32>
    %201 = arith.mulf %192, %170 : vector<2x32xf32>
    %202 = arith.mulf %186, %194 : vector<2x32xf32>
    %203 = arith.addf %201, %202 : vector<2x32xf32>
    %204 = math.tanh %203 : vector<2x32xf32>
    %205 = arith.mulf %200, %204 : vector<2x32xf32>
    %206 = arith.index_cast %176 : i32 to index
    %c0_54 = arith.constant 0 : index
    %207 = vector.load %arg12[%206, %c0_54] : memref<16x32xf32, #tpu.memory_space<vmem>>, vector<2x32xf32>
    tpu.vector_store %arg12[%206, %c0_54], %205 {strides = array<i32>} : memref<16x32xf32, #tpu.memory_space<vmem>>, vector<2x32xf32>,
    %c6_i32 = arith.constant 6 : i32
    %c2_i32_55 = arith.constant 2 : i32
    %208 = arith.muli %c6_i32, %c2_i32_55 : i32
    %209 = tpu.assume_multiple %208, 2 : i32
    %210 = arith.index_cast %209 : i32 to index
    %c0_56 = arith.constant 0 : index
    %211 = vector.load %arg11[%210, %c0_56] : memref<16x128xf32, #tpu.memory_space<vmem>>, vector<2x128xf32>
    %cst_57 = arith.constant dense<0.000000e+00> : vector<2x128xf32>
    %212 = tpu.matmul %205, %7, %cst_57 {dimension_numbers = #tpu.dot_dimension_numbers<[1], [0], [0], [1], [0, 0, 1, 1], [], []>} : vector<2x32xf32>, vector<32x128xf32>, vector<2x128xf32> -> vector<2x128xf32>
    %213 = arith.addf %211, %212 : vector<2x128xf32>
    %214 = vector.extract_strided_slice %213 {offsets = [0, 0], sizes = [2, 32], strides = [1, 1]} : vector<2x128xf32> to vector<2x32xf32>
    %215 = arith.negf %214 : vector<2x32xf32>
    %216 = math.exp %215 : vector<2x32xf32>
    %cst_58 = arith.constant 1.000000e+00 : f32
    %217 = vector.broadcast %cst_58 : f32 to vector<2x32xf32>
    %218 = arith.addf %217, %216 : vector<2x32xf32>
    %219 = arith.divf %217, %218 : vector<2x32xf32>
    %220 = vector.extract_strided_slice %213 {offsets = [0, 32], sizes = [2, 32], strides = [1, 1]} : vector<2x128xf32> to vector<2x32xf32>
    %221 = arith.negf %220 : vector<2x32xf32>
    %222 = math.exp %221 : vector<2x32xf32>
    %cst_59 = arith.constant 1.000000e+00 : f32
    %223 = vector.broadcast %cst_59 : f32 to vector<2x32xf32>
    %224 = arith.addf %223, %222 : vector<2x32xf32>
    %225 = arith.divf %223, %224 : vector<2x32xf32>
    %226 = vector.extract_strided_slice %213 {offsets = [0, 64], sizes = [2, 32], strides = [1, 1]} : vector<2x128xf32> to vector<2x32xf32>
    %227 = math.tanh %226 : vector<2x32xf32>
    %228 = vector.extract_strided_slice %213 {offsets = [0, 96], sizes = [2, 32], strides = [1, 1]} : vector<2x128xf32> to vector<2x32xf32>
    %229 = arith.negf %228 : vector<2x32xf32>
    %230 = math.exp %229 : vector<2x32xf32>
    %cst_60 = arith.constant 1.000000e+00 : f32
    %231 = vector.broadcast %cst_60 : f32 to vector<2x32xf32>
    %232 = arith.addf %231, %230 : vector<2x32xf32>
    %233 = arith.divf %231, %232 : vector<2x32xf32>
    %234 = arith.mulf %225, %203 : vector<2x32xf32>
    %235 = arith.mulf %219, %227 : vector<2x32xf32>
    %236 = arith.addf %234, %235 : vector<2x32xf32>
    %237 = math.tanh %236 : vector<2x32xf32>
    %238 = arith.mulf %233, %237 : vector<2x32xf32>
    %239 = arith.index_cast %209 : i32 to index
    %c0_61 = arith.constant 0 : index
    %240 = vector.load %arg12[%239, %c0_61] : memref<16x32xf32, #tpu.memory_space<vmem>>, vector<2x32xf32>
    tpu.vector_store %arg12[%239, %c0_61], %238 {strides = array<i32>} : memref<16x32xf32, #tpu.memory_space<vmem>>, vector<2x32xf32>,
    %c7_i32 = arith.constant 7 : i32
    %c2_i32_62 = arith.constant 2 : i32
    %241 = arith.muli %c7_i32, %c2_i32_62 : i32
    %242 = tpu.assume_multiple %241, 2 : i32
    %243 = arith.index_cast %242 : i32 to index
    %c0_63 = arith.constant 0 : index
    %244 = vector.load %arg11[%243, %c0_63] : memref<16x128xf32, #tpu.memory_space<vmem>>, vector<2x128xf32>
    %cst_64 = arith.constant dense<0.000000e+00> : vector<2x128xf32>
    %245 = tpu.matmul %238, %7, %cst_64 {dimension_numbers = #tpu.dot_dimension_numbers<[1], [0], [0], [1], [0, 0, 1, 1], [], []>} : vector<2x32xf32>, vector<32x128xf32>, vector<2x128xf32> -> vector<2x128xf32>
    %246 = arith.addf %244, %245 : vector<2x128xf32>
    %247 = vector.extract_strided_slice %246 {offsets = [0, 0], sizes = [2, 32], strides = [1, 1]} : vector<2x128xf32> to vector<2x32xf32>
    %248 = arith.negf %247 : vector<2x32xf32>
    %249 = math.exp %248 : vector<2x32xf32>
    %cst_65 = arith.constant 1.000000e+00 : f32
    %250 = vector.broadcast %cst_65 : f32 to vector<2x32xf32>
    %251 = arith.addf %250, %249 : vector<2x32xf32>
    %252 = arith.divf %250, %251 : vector<2x32xf32>
    %253 = vector.extract_strided_slice %246 {offsets = [0, 32], sizes = [2, 32], strides = [1, 1]} : vector<2x128xf32> to vector<2x32xf32>
    %254 = arith.negf %253 : vector<2x32xf32>
    %255 = math.exp %254 : vector<2x32xf32>
    %cst_66 = arith.constant 1.000000e+00 : f32
    %256 = vector.broadcast %cst_66 : f32 to vector<2x32xf32>
    %257 = arith.addf %256, %255 : vector<2x32xf32>
    %258 = arith.divf %256, %257 : vector<2x32xf32>
    %259 = vector.extract_strided_slice %246 {offsets = [0, 64], sizes = [2, 32], strides = [1, 1]} : vector<2x128xf32> to vector<2x32xf32>
    %260 = math.tanh %259 : vector<2x32xf32>
    %261 = vector.extract_strided_slice %246 {offsets = [0, 96], sizes = [2, 32], strides = [1, 1]} : vector<2x128xf32> to vector<2x32xf32>
    %262 = arith.negf %261 : vector<2x32xf32>
    %263 = math.exp %262 : vector<2x32xf32>
    %cst_67 = arith.constant 1.000000e+00 : f32
    %264 = vector.broadcast %cst_67 : f32 to vector<2x32xf32>
    %265 = arith.addf %264, %263 : vector<2x32xf32>
    %266 = arith.divf %264, %265 : vector<2x32xf32>
    %267 = arith.mulf %258, %236 : vector<2x32xf32>
    %268 = arith.mulf %252, %260 : vector<2x32xf32>
    %269 = arith.addf %267, %268 : vector<2x32xf32>
    %270 = math.tanh %269 : vector<2x32xf32>
    %271 = arith.mulf %266, %270 : vector<2x32xf32>
    %272 = arith.index_cast %242 : i32 to index
    %c0_68 = arith.constant 0 : index
    %273 = vector.load %arg12[%272, %c0_68] : memref<16x32xf32, #tpu.memory_space<vmem>>, vector<2x32xf32>
    tpu.vector_store %arg12[%272, %c0_68], %271 {strides = array<i32>} : memref<16x32xf32, #tpu.memory_space<vmem>>, vector<2x32xf32>,
    %c8_i32 = arith.constant 8 : i32
    %c0_69 = arith.constant 0 : index
    %c0_70 = arith.constant 0 : index
    %274 = vector.load %arg12[%c0_69, %c0_70] : memref<16x32xf32, #tpu.memory_space<vmem>>, vector<16x32xf32>
    %c0_71 = arith.constant 0 : index
    %c0_72 = arith.constant 0 : index
    %275 = vector.load %arg6[%c0_71, %c0_72] : memref<32x4xf32, #tpu.memory_space<vmem>>, vector<32x4xf32>
    %cst_73 = arith.constant dense<0.000000e+00> : vector<16x4xf32>
    %276 = tpu.matmul %274, %275, %cst_73 {dimension_numbers = #tpu.dot_dimension_numbers<[1], [0], [0], [1], [0, 0, 1, 1], [], []>} : vector<16x32xf32>, vector<32x4xf32>, vector<16x4xf32> -> vector<16x4xf32>
    %c0_74 = arith.constant 0 : index
    %c0_75 = arith.constant 0 : index
    %277 = vector.load %arg7[%c0_74, %c0_75] : memref<1x4xf32, #tpu.memory_space<vmem>>, vector<1x4xf32>
    %278 = vector.broadcast %277 : vector<1x4xf32> to vector<16x4xf32>
    %279 = arith.addf %276, %278 : vector<16x4xf32>
    %c0_76 = arith.constant 0 : index
    %c0_77 = arith.constant 0 : index
    %280 = vector.load %arg8[%c0_76, %c0_77] : memref<16x4xf32, #tpu.memory_space<vmem>>, vector<16x4xf32>
    tpu.vector_store %arg8[%c0_76, %c0_77], %279 {strides = array<i32>} : memref<16x4xf32, #tpu.memory_space<vmem>>, vector<16x4xf32>,
    %c0_78 = arith.constant 0 : index
    %c0_79 = arith.constant 0 : index
    %281 = vector.load %arg9[%c0_78, %c0_79] : memref<2x32xf32, #tpu.memory_space<vmem>>, vector<2x32xf32>
    tpu.vector_store %arg9[%c0_78, %c0_79], %271 {strides = array<i32>} : memref<2x32xf32, #tpu.memory_space<vmem>>, vector<2x32xf32>,
    %c0_80 = arith.constant 0 : index
    %c0_81 = arith.constant 0 : index
    %282 = vector.load %arg10[%c0_80, %c0_81] : memref<2x32xf32, #tpu.memory_space<vmem>>, vector<2x32xf32>
    tpu.vector_store %arg10[%c0_80, %c0_81], %269 {strides = array<i32>} : memref<2x32xf32, #tpu.memory_space<vmem>>, vector<2x32xf32>,
    return
  }
}

</mosaic_0001>

<bundles_post_ra>
// kernel: tpu_custom_call.1
= control target key start
LH: loop header
LB: loop body
LE: loop exit
PB: predicated region body
PF: predicated region fallthrough
CT: control target
= control target key end

     0   :  { %16 = vsyncpa [#allocation5], 0  ;;  %vm51_vm0 = vcmask 1043456   ;;  %vm44_vm1 = vcmask 31744   ;;  %v1408_v4 = vmov 0.0   ;;  %s1672_s0 = inlined_call_operand.vmem [shape: f32[16,4], index: 0, kind: input, shape index: {}]   ;;  %s1673_s1 = inlined_call_operand.vmem [shape: f32[2,32], index: 1, kind: input, shape index: {}]   ;;  %s1674_s2 = inlined_call_operand.vmem [shape: f32[2,32], index: 2, kind: input, shape index: {}]   ;;  %s1675_s3 = inlined_call_operand.vmem [shape: f32[4,128], index: 3, kind: input, shape index: {}]   ;;  %s1676_s4 = inlined_call_operand.vmem [shape: f32[32,128], index: 4, kind: input, shape index: {}]   ;;  %s1677_s5 = inlined_call_operand.vmem [shape: f32[1,128], index: 5, kind: input, shape index: {}]   ;;  %s1678_s6 = inlined_call_operand.vmem [shape: f32[32,4], index: 6, kind: input, shape index: {}]   ;;  %s1679_s7 = inlined_call_operand.vmem [shape: f32[1,4], index: 7, kind: input, shape index: {}]   ;;  %s1680_s8 = inlined_call_operand.vmem [shape: f32[16,4], index: 8, kind: output, shape index: {0}]   ;;  %s1681_s9 = inlined_call_operand.hbm [shape: f32[2,32], index: 9, kind: output, shape index: {1}]   ;;  %s1682_s10 = inlined_call_operand.hbm [shape: f32[2,32], index: 10, kind: output, shape index: {2}]  }
   0x1   :  { %v36_v0 = vld [vmem:[%s1675_s3] sm:$0xf]  ;;  %v35_v2 = vld [vmem:[%s1672_s0 + $0x8] sm:$0xff]  ;;  %v1483_v3 = vld [vmem:[%s1676_s4 + $0x18] sm:$0xff]  ;;  %1194 = vmatprep.subr.mxu1 %v1408_v4 }
   0x2   :  { %v34_v1 = vld [vmem:[%s1672_s0] sm:$0xff]  ;;  %1189 = vmatprep.subr.msk.mxu0 %vm51_vm0, %v36_v0  ;;  %v1489_v5 = vld [vmem:[%s1676_s4 + $0x10] sm:$0xff] }
   0x3   :  { %1191 = vmatprep.mubr.msk.f32.mxu0 %vm44_vm1, %v34_v1  ;;  %1190 = vmatpush3.msk.msra.mxu0 %vm51_vm0, %v36_v0 }
   0x4   :  { %17 = vsyncpa [#allocation7], 0  ;;  %1192 = vmatmul.mubr.msk.f32.vlgmr.msra.gmra.mxu0 %vm44_vm1, %v35_v2  ;;  %1195 = vmatpush3.msra.mxu1 %v1483_v3  ;;  %v1497_v6 = vld [vmem:[%s1676_s4 + $0x8] sm:$0xff]  ;;  %vm1409_vm2 = vmmov 0   ;;  %v1507_v7 = vld [vmem:[%s1676_s4] sm:$0xff]  ;;  %vm139_vm3 = vcmask 261120  }
   0x5   :  { %1196 = vmatprep.subr.mxu1 %v1408_v4  ;;  %1202 = vmatprep.mubr.msk.f32.mxu1 %vm1409_vm2, %v1408_v4  ;;  %v136_v8 = vld [vmem:[%s1673_s1] sm:$0x3]  ;;  %s1410_s27 = smov 64   ;;  %vm246_vm4 = vcmask 254976   ;;  %s1414_s19 = smov [#allocation6]  }
   0x6   :  { %1197 = vmatpush3.msra.mxu1 %v1489_v5  ;;  %1205 = vmatprep.subr.mxu0 %v1408_v4  ;;  %v1117_v9 = vld [vmem:[%s1677_s5] ss:$0 sm:$0xff]  ;;  %s1411_s5 = smov 32   ;;  %s1103_s20 = sshll.u32 %s1414_s19, 4  ;;  %s1104_s20 = int_to_ptr.vmem [resolvable:$true] %s1103_s20 }
   0x7   :  { %1198 = vmatprep.subr.mxu1 %v1408_v4  ;;  %1206 = vmatpush3.msra.mxu0 %v1483_v3  ;;  %v137_v19 = vld [vmem:[%s1674_s2] sm:$0x3]  ;;  %s1412_s2 = smov 96  }
   0x8   :  { %1199 = vmatpush3.msra.mxu1 %v1497_v6  ;;  %1207 = vmatprep.subr.mxu0 %v1408_v4 }
   0x9   :  { %1200 = vmatprep.subr.mxu1 %v1408_v4  ;;  %1208 = vmatpush3.msra.mxu0 %v1489_v5 }
   0xa   :  { %1201 = vmatpush3.msra.mxu1 %v1507_v7  ;;  %1209 = vmatprep.subr.mxu0 %v1408_v4 }
   0xb   :  { %1203 = vmatmul.mubr.msk.f32.vlgmr.msra.gmra.mxu1 %vm139_vm3, %v136_v8  ;;  %1210 = vmatpush3.msra.mxu0 %v1497_v6 }
   0xc   :  { %1211 = vmatprep.subr.mxu0 %v1408_v4  ;;  %1213 = vmatprep.mubr.msk.f32.mxu0 %vm1409_vm2, %v1408_v4 }
   0xd   :  { %1212 = vmatpush3.msra.mxu0 %v1507_v7  ;;  %1216 = vmatprep.subr.mxu1 %v1408_v4 }
   0xe   :  { %1217 = vmatpush3.msra.mxu1 %v1483_v3  ;;  %1224 = vmatprep.mubr.msk.f32.mxu1 %vm1409_vm2, %v1408_v4 }
   0xf   :  { %1218 = vmatprep.subr.mxu1 %v1408_v4  ;;  %1227 = vmatprep.subr.mxu0 %v1408_v4 }
  0x10   :  { %1219 = vmatpush3.msra.mxu1 %v1489_v5 }
  0x11   :  { %1220 = vmatprep.subr.mxu1 %v1408_v4 }
  0x12   :  { %1221 = vmatpush3.msra.mxu1 %v1497_v6 }
  0x13   :  { %1222 = vmatprep.subr.mxu1 %v1408_v4 }
  0x14   :  { %1223 = vmatpush3.msra.mxu1 %v1507_v7 }
  0x15   :  { %1238 = vmatprep.subr.mxu1 %v1408_v4 }
  0xc4   :  { %v1193_v10 = vpop.f32.mrf.mxu0 }
  0xc5   :  { %v127_v11 = vadd.f32 %v1193_v10, %v1117_v9 }
  0xc6   :  { %v121_v12 = vpop.f32.mrf.mxu0 }
  0xc7   :  { %131 = vst [vmem:[#allocation2 + $0x8] sm:$0xff] %v127_v11  ;;  %v122_v13 = vadd.f32 %v1117_v9, %v121_v12 }
  0xc9   :  { %130 = vst [vmem:[#allocation2] sm:$0xff] %v122_v13 }
  0xcb   :  { %v209_v14 = vpop.f32.mrf.mxu1 }
  0xcd   :  { %v1204_v15 = vpop.f32.mrf.mxu1 }
  0xd0   :  { %v138_v16 = vld [vmem:[#allocation2] sm:$0x3]  ;;  %v249_v34 = vld [vmem:[#allocation2 + $0x2] sm:$0x3]  ;;  %v354_v52 = vld [vmem:[#allocation2 + $0x4] sm:$0x3] }
  0xd1   :  { %v213_v17 = vadd.f32 %v209_v14, %v138_v16  ;;  %v459_v11 = vld [vmem:[#allocation2 + $0x6] sm:$0x3] }
  0xd3   :  { %1300 = vtanh.f32 %v213_v17  ;;  %v1122_v20 = vmul.f32 -1.442695, %v213_v17 }
  0xd5   :  { %1302 = vpow2.f32 %v1122_v20 }
  0xe0   :  { %v1301_v18 = vpop.eup %1300 }
  0xe1   :  { %227 = vrot.lane.b32.xlu0 %v1301_v18, %s1410_s27 }
  0xe2   :  { %v1303_v21 = vpop.eup %1302 }
  0xe3   :  { %v217_v22 = vadd.f32 1.0, %v1303_v21 }
  0xe5   :  { %222 = vrot.lane.b32.xlu0 %v137_v19, %s1411_s5  ;;  %1304 = vrcp.f32 %v217_v22 }
  0xf2   :  { %v1305_v23 = vpop.eup %1304 }
 0x153   :  { %v228_v24 = vpop.permute.xlu0 %227 }
 0x154   :  { %v230_v25 = vmul.f32 %v1305_v23, %v228_v24 }
 0x156   :  { %232 = vrot.lane.b32.xlu1 %v230_v25, %s1411_s5 }
 0x157   :  { %v223_v26 = vpop.permute.xlu0 %222 }
 0x158   :  { %v225_v27 = vmul.f32 %v1305_v23, %v223_v26 }
 0x1c8   :  { %v233_v28 = vpop.permute.xlu1 %232 }
 0x1c9   :  { %v235_v29 = vadd.f32 %v233_v28, %v225_v27 }
 0x1cb   :  { %1306 = vtanh.f32 %v235_v29 }
 0x1d8   :  { %v1307_v30 = vpop.eup %1306 }
 0x1d9   :  { %238 = vrot.lane.b32.xlu1 %v1307_v30, %s1410_s27 }
 0x24b   :  { %v239_v31 = vpop.permute.xlu1 %238 }
 0x24c   :  { %v241_v32 = vmul.f32 %v1305_v23, %v239_v31 }
 0x24e   :  { %243 = vrot.lane.b32.xlu0 %v241_v32, %s1411_s5 }
 0x2c0   :  { %v244_v33 = vpop.permute.xlu0 %243 }
 0x2c1   :  { %247 = vst.msk [vmem:[#allocation3] sm:$0x3] %vm246_vm4, %v244_v33  ;;  %1214 = vmatmul.mubr.msk.f32.vlgmr.msra.gmra.mxu0 %vm139_vm3, %v244_v33 }
 0x2c2   :  { %1228 = vmatpush3.msra.mxu0 %v1483_v3  ;;  %1235 = vmatprep.mubr.msk.f32.mxu0 %vm1409_vm2, %v1408_v4 }
 0x2c3   :  { %1229 = vmatprep.subr.mxu0 %v1408_v4 }
 0x2c4   :  { %1230 = vmatpush3.msra.mxu0 %v1489_v5 }
 0x2c5   :  { %1231 = vmatprep.subr.mxu0 %v1408_v4 }
 0x2c6   :  { %1232 = vmatpush3.msra.mxu0 %v1497_v6 }
 0x2c7   :  { %1233 = vmatprep.subr.mxu0 %v1408_v4 }
 0x2c8   :  { %1234 = vmatpush3.msra.mxu0 %v1507_v7 }
 0x2c9   :  { %1249 = vmatprep.subr.mxu0 %v1408_v4 }
 0x381   :  { %v318_v35 = vpop.f32.mrf.mxu0 }
 0x382   :  { %v322_v36 = vadd.f32 %v318_v35, %v249_v34 }
 0x383   :  { %v1215_v37 = vpop.f32.mrf.mxu0 }
 0x384   :  { %1308 = vtanh.f32 %v322_v36  ;;  %v1124_v39 = vmul.f32 -1.442695, %v322_v36 }
 0x386   :  { %1310 = vpow2.f32 %v1124_v39 }
 0x391   :  { %v1309_v38 = vpop.eup %1308 }
 0x392   :  { %332 = vrot.lane.b32.xlu1 %v1309_v38, %s1410_s27 }
 0x393   :  { %v1311_v40 = vpop.eup %1310 }
 0x394   :  { %v326_v41 = vadd.f32 1.0, %v1311_v40 }
 0x396   :  { %1312 = vrcp.f32 %v326_v41 }
 0x3a3   :  { %v1313_v42 = vpop.eup %1312 }
 0x3a4   :  { %v330_v45 = vmul.f32 %v1313_v42, %v235_v29  ;;  %v564_v29 = vld [vmem:[#allocation2 + $0x8] sm:$0x3] }
 0x404   :  { %v333_v43 = vpop.permute.xlu1 %332 }
 0x405   :  { %v335_v44 = vmul.f32 %v1313_v42, %v333_v43 }
 0x407   :  { %337 = vrot.lane.b32.xlu0 %v335_v44, %s1411_s5 }
 0x479   :  { %v338_v46 = vpop.permute.xlu0 %337 }
 0x47a   :  { %v340_v47 = vadd.f32 %v338_v46, %v330_v45 }
 0x47c   :  { %1314 = vtanh.f32 %v340_v47 }
 0x489   :  { %v1315_v48 = vpop.eup %1314 }
 0x48a   :  { %343 = vrot.lane.b32.xlu1 %v1315_v48, %s1410_s27 }
 0x4fc   :  { %v344_v49 = vpop.permute.xlu1 %343 }
 0x4fd   :  { %v346_v50 = vmul.f32 %v1313_v42, %v344_v49 }
 0x4ff   :  { %348 = vrot.lane.b32.xlu0 %v346_v50, %s1411_s5 }
 0x571   :  { %v349_v51 = vpop.permute.xlu0 %348 }
 0x572   :  { %352 = vst.msk [vmem:[#allocation3 + $0x2] sm:$0x3] %vm246_vm4, %v349_v51  ;;  %1225 = vmatmul.mubr.msk.f32.vlgmr.msra.gmra.mxu1 %vm139_vm3, %v349_v51 }
 0x573   :  { %1239 = vmatpush3.msra.mxu1 %v1483_v3  ;;  %1246 = vmatprep.mubr.msk.f32.mxu1 %vm1409_vm2, %v1408_v4 }
 0x574   :  { %1240 = vmatprep.subr.mxu1 %v1408_v4 }
 0x575   :  { %1241 = vmatpush3.msra.mxu1 %v1489_v5 }
 0x576   :  { %1242 = vmatprep.subr.mxu1 %v1408_v4 }
 0x577   :  { %1243 = vmatpush3.msra.mxu1 %v1497_v6 }
 0x578   :  { %1244 = vmatprep.subr.mxu1 %v1408_v4 }
 0x579   :  { %1245 = vmatpush3.msra.mxu1 %v1507_v7 }
 0x57a   :  { %1260 = vmatprep.subr.mxu1 %v1408_v4 }
 0x632   :  { %v423_v53 = vpop.f32.mrf.mxu1 }
 0x633   :  { %v427_v54 = vadd.f32 %v423_v53, %v354_v52 }
 0x634   :  { %v1226_v55 = vpop.f32.mrf.mxu1 }
 0x635   :  { %1316 = vtanh.f32 %v427_v54  ;;  %v1126_v57 = vmul.f32 -1.442695, %v427_v54 }
 0x637   :  { %1318 = vpow2.f32 %v1126_v57 }
 0x642   :  { %v1317_v56 = vpop.eup %1316 }
 0x643   :  { %437 = vrot.lane.b32.xlu1 %v1317_v56, %s1410_s27 }
 0x644   :  { %v1319_v58 = vpop.eup %1318 }
 0x645   :  { %v431_v59 = vadd.f32 1.0, %v1319_v58 }
 0x647   :  { %1320 = vrcp.f32 %v431_v59 }
 0x654   :  { %v1321_v60 = vpop.eup %1320 }
 0x655   :  { %v435_v63 = vmul.f32 %v1321_v60, %v340_v47  ;;  %v669_v47 = vld [vmem:[#allocation2 + $0xa] sm:$0x3] }
 0x6b5   :  { %v438_v61 = vpop.permute.xlu1 %437 }
 0x6b6   :  { %v440_v62 = vmul.f32 %v1321_v60, %v438_v61  ;;  %v774_v61 = vld [vmem:[#allocation2 + $0xc] sm:$0x3] }
 0x6b8   :  { %442 = vrot.lane.b32.xlu0 %v440_v62, %s1411_s5 }
 0x72a   :  { %v443_v0 = vpop.permute.xlu0 %442 }
 0x72b   :  { %v445_v1 = vadd.f32 %v443_v0, %v435_v63 }
 0x72d   :  { %1322 = vtanh.f32 %v445_v1 }
 0x73a   :  { %v1323_v2 = vpop.eup %1322 }
 0x73b   :  { %448 = vrot.lane.b32.xlu1 %v1323_v2, %s1410_s27 }
 0x7ad   :  { %v449_v8 = vpop.permute.xlu1 %448 }
 0x7ae   :  { %v451_v9 = vmul.f32 %v1321_v60, %v449_v8 }
 0x7b0   :  { %453 = vrot.lane.b32.xlu0 %v451_v9, %s1411_s5 }
 0x822   :  { %v454_v10 = vpop.permute.xlu0 %453 }
 0x823   :  { %457 = vst.msk [vmem:[#allocation3 + $0x4] sm:$0x3] %vm246_vm4, %v454_v10  ;;  %1236 = vmatmul.mubr.msk.f32.vlgmr.msra.gmra.mxu0 %vm139_vm3, %v454_v10 }
 0x824   :  { %1250 = vmatpush3.msra.mxu0 %v1483_v3  ;;  %1257 = vmatprep.mubr.msk.f32.mxu0 %vm1409_vm2, %v1408_v4 }
 0x825   :  { %1251 = vmatprep.subr.mxu0 %v1408_v4 }
 0x826   :  { %1252 = vmatpush3.msra.mxu0 %v1489_v5 }
 0x827   :  { %1253 = vmatprep.subr.mxu0 %v1408_v4 }
 0x828   :  { %1254 = vmatpush3.msra.mxu0 %v1497_v6 }
 0x829   :  { %1255 = vmatprep.subr.mxu0 %v1408_v4 }
 0x82a   :  { %1256 = vmatpush3.msra.mxu0 %v1507_v7 }
 0x82b   :  { %1271 = vmatprep.subr.mxu0 %v1408_v4 }
 0x8e3   :  { %v528_v12 = vpop.f32.mrf.mxu0 }
 0x8e4   :  { %v532_v13 = vadd.f32 %v528_v12, %v459_v11 }
 0x8e5   :  { %v1237_v14 = vpop.f32.mrf.mxu0 }
 0x8e6   :  { %1324 = vtanh.f32 %v532_v13  ;;  %v1128_v16 = vmul.f32 -1.442695, %v532_v13 }
 0x8e8   :  { %1326 = vpow2.f32 %v1128_v16 }
 0x8f3   :  { %v1325_v15 = vpop.eup %1324 }
 0x8f4   :  { %542 = vrot.lane.b32.xlu1 %v1325_v15, %s1410_s27 }
 0x8f5   :  { %v1327_v17 = vpop.eup %1326 }
 0x8f6   :  { %v536_v18 = vadd.f32 1.0, %v1327_v17 }
 0x8f8   :  { %1328 = vrcp.f32 %v536_v18 }
 0x905   :  { %v1329_v19 = vpop.eup %1328 }
 0x906   :  { %v540_v22 = vmul.f32 %v1329_v19, %v445_v1 }
 0x966   :  { %v543_v20 = vpop.permute.xlu1 %542 }
 0x967   :  { %v545_v21 = vmul.f32 %v1329_v19, %v543_v20  ;;  %v879_v20 = vld [vmem:[#allocation2 + $0xe] sm:$0x3] }
 0x969   :  { %547 = vrot.lane.b32.xlu0 %v545_v21, %s1411_s5 }
 0x9db   :  { %v548_v23 = vpop.permute.xlu0 %547 }
 0x9dc   :  { %v550_v24 = vadd.f32 %v548_v23, %v540_v22 }
 0x9de   :  { %1330 = vtanh.f32 %v550_v24 }
 0x9eb   :  { %v1331_v25 = vpop.eup %1330 }
 0x9ec   :  { %553 = vrot.lane.b32.xlu1 %v1331_v25, %s1410_s27 }
 0xa5e   :  { %v554_v26 = vpop.permute.xlu1 %553 }
 0xa5f   :  { %v556_v27 = vmul.f32 %v1329_v19, %v554_v26 }
 0xa61   :  { %558 = vrot.lane.b32.xlu0 %v556_v27, %s1411_s5 }
 0xad3   :  { %v559_v28 = vpop.permute.xlu0 %558 }
 0xad4   :  { %562 = vst.msk [vmem:[#allocation3 + $0x6] sm:$0x3] %vm246_vm4, %v559_v28  ;;  %1247 = vmatmul.mubr.msk.f32.vlgmr.msra.gmra.mxu1 %vm139_vm3, %v559_v28 }
 0xad5   :  { %1261 = vmatpush3.msra.mxu1 %v1483_v3  ;;  %1268 = vmatprep.mubr.msk.f32.mxu1 %vm1409_vm2, %v1408_v4 }
 0xad6   :  { %1262 = vmatprep.subr.mxu1 %v1408_v4 }
 0xad7   :  { %1263 = vmatpush3.msra.mxu1 %v1489_v5 }
 0xad8   :  { %1264 = vmatprep.subr.mxu1 %v1408_v4 }
 0xad9   :  { %1265 = vmatpush3.msra.mxu1 %v1497_v6 }
 0xada   :  { %1266 = vmatprep.subr.mxu1 %v1408_v4 }
 0xadb   :  { %1267 = vmatpush3.msra.mxu1 %v1507_v7  ;;  %v983_v60 = vld [vmem:[#allocation3] sm:$0xff] }
 0xb94   :  { %v633_v30 = vpop.f32.mrf.mxu1 }
 0xb95   :  { %v637_v31 = vadd.f32 %v633_v30, %v564_v29 }
 0xb96   :  { %v1248_v32 = vpop.f32.mrf.mxu1 }
 0xb97   :  { %1332 = vtanh.f32 %v637_v31  ;;  %v1130_v34 = vmul.f32 -1.442695, %v637_v31 }
 0xb99   :  { %1334 = vpow2.f32 %v1130_v34 }
 0xba4   :  { %v1333_v33 = vpop.eup %1332 }
 0xba5   :  { %647 = vrot.lane.b32.xlu1 %v1333_v33, %s1410_s27 }
 0xba6   :  { %v1335_v35 = vpop.eup %1334 }
 0xba7   :  { %v641_v36 = vadd.f32 1.0, %v1335_v35  ;;  %v988_v35 = vld [vmem:[%s1678_s6 + $0x18] sm:$0xff] }
 0xba8   :  { %1282 = vmatprep.subr.mxu1 %v988_v35 }
 0xba9   :  { %1336 = vrcp.f32 %v641_v36  ;;  %v987_v36 = vld [vmem:[%s1678_s6 + $0x10] sm:$0xff] }
 0xbb6   :  { %v1337_v37 = vpop.eup %1336 }
 0xbb7   :  { %v645_v40 = vmul.f32 %v1337_v37, %v550_v24 }
 0xc17   :  { %v648_v38 = vpop.permute.xlu1 %647 }
 0xc18   :  { %v650_v39 = vmul.f32 %v1337_v37, %v648_v38  ;;  %v985_v38 = vld [vmem:[%s1678_s6] sm:$0xff] }
 0xc1a   :  { %652 = vrot.lane.b32.xlu0 %v650_v39, %s1411_s5 }
 0xc8c   :  { %v653_v41 = vpop.permute.xlu0 %652 }
 0xc8d   :  { %v655_v42 = vadd.f32 %v653_v41, %v645_v40 }
 0xc8f   :  { %1338 = vtanh.f32 %v655_v42 }
 0xc9c   :  { %v1339_v43 = vpop.eup %1338 }
 0xc9d   :  { %658 = vrot.lane.b32.xlu1 %v1339_v43, %s1410_s27 }
 0xd0f   :  { %v659_v44 = vpop.permute.xlu1 %658 }
 0xd10   :  { %v661_v45 = vmul.f32 %v1337_v37, %v659_v44  ;;  %v986_v37 = vld [vmem:[%s1678_s6 + $0x8] sm:$0xff]  ;;  %s1413_s6 = smov [#allocation4]  }
 0xd11   :  { %s1093_s18 = sshll.u32 %s1413_s6, 4  ;;  %s1094_s18 = int_to_ptr.vmem [resolvable:$true] %s1093_s18 }
 0xd12   :  { %663 = vrot.lane.b32.xlu0 %v661_v45, %s1411_s5  ;;  %s1364_s3 = scalar_lea.vmem %s1094_s18, 32  ;;  %p1369_p1 = scmp.lt.s32.totalorder %s1094_s18, %s1094_s18 }
 0xd13   :  { %p1365_p0 = scmp.ne.s32.totalorder %s1094_s18, %s1364_s3  ;;  %p1370_p2 = scmp.lt.s32.totalorder %s1364_s3, %s1364_s3 }
 0xd15   :  { %p1371_p3 = por %p1370_p2, %p1369_p1 }
 0xd17   :  { %p1372_p4 = pnand %p1371_p3, %p1365_p0 }
 0xd84   :  { %v664_v46 = vpop.permute.xlu0 %663 }
 0xd85   :  { %667 = vst.msk [vmem:[#allocation3 + $0x8] sm:$0x3] %vm246_vm4, %v664_v46  ;;  %1258 = vmatmul.mubr.msk.f32.vlgmr.msra.gmra.mxu0 %vm139_vm3, %v664_v46 }
 0xd86   :  { %1272 = vmatpush3.msra.mxu0 %v1483_v3  ;;  %1279 = vmatprep.mubr.msk.f32.mxu0 %vm1409_vm2, %v1408_v4 }
 0xd87   :  { %1273 = vmatprep.subr.mxu0 %v1408_v4 }
 0xd88   :  { %1274 = vmatpush3.msra.mxu0 %v1489_v5 }
 0xd89   :  { %1275 = vmatprep.subr.mxu0 %v1408_v4 }
 0xd8a   :  { %1276 = vmatpush3.msra.mxu0 %v1497_v6 }
 0xd8b   :  { %1277 = vmatprep.subr.mxu0 %v1408_v4 }
 0xd8c   :  { %1278 = vmatpush3.msra.mxu0 %v1507_v7 }
 0xe45   :  { %v738_v48 = vpop.f32.mrf.mxu0 }
 0xe46   :  { %v742_v49 = vadd.f32 %v738_v48, %v669_v47 }
 0xe47   :  { %v1259_v50 = vpop.f32.mrf.mxu0 }
 0xe48   :  { %1340 = vtanh.f32 %v742_v49  ;;  %v1132_v51 = vmul.f32 -1.442695, %v742_v49 }
 0xe4a   :  { %1342 = vpow2.f32 %v1132_v51 }
 0xe55   :  { %v1341_v3 = vpop.eup %1340 }
 0xe56   :  { %752 = vrot.lane.b32.xlu1 %v1341_v3, %s1410_s27 }
 0xe57   :  { %v1343_v52 = vpop.eup %1342 }
 0xe58   :  { %v746_v5 = vadd.f32 1.0, %v1343_v52 }
 0xe5a   :  { %1344 = vrcp.f32 %v746_v5 }
 0xe67   :  { %v1345_v53 = vpop.eup %1344 }
 0xe68   :  { %v750_v4 = vmul.f32 %v1345_v53, %v655_v42 }
 0xec8   :  { %v753_v54 = vpop.permute.xlu1 %752 }
 0xec9   :  { %v755_v6 = vmul.f32 %v1345_v53, %v753_v54 }
 0xecb   :  { %757 = vrot.lane.b32.xlu0 %v755_v6, %s1411_s5 }
 0xf3d   :  { %v758_v7 = vpop.permute.xlu0 %757 }
 0xf3e   :  { %v760_v55 = vadd.f32 %v758_v7, %v750_v4 }
 0xf40   :  { %1346 = vtanh.f32 %v760_v55 }
 0xf4d   :  { %v1347_v56 = vpop.eup %1346 }
 0xf4e   :  { %763 = vrot.lane.b32.xlu1 %v1347_v56, %s1410_s27 }
 0xfc0   :  { %v764_v57 = vpop.permute.xlu1 %763 }
 0xfc1   :  { %v766_v58 = vmul.f32 %v1345_v53, %v764_v57 }
 0xfc3   :  { %768 = vrot.lane.b32.xlu0 %v766_v58, %s1411_s5 }
0x1035   :  { %v769_v59 = vpop.permute.xlu0 %768 }
0x1036   :  { %772 = vst.msk [vmem:[#allocation3 + $0xa] sm:$0x3] %vm246_vm4, %v769_v59  ;;  %1269 = vmatmul.mubr.msk.f32.vlgmr.msra.gmra.mxu1 %vm139_vm3, %v769_v59 }
0x1037   :  { %1290 = vmatprep.mubr.msk.f32.mxu1 %vm139_vm3, %v983_v60  ;;  %1283 = vmatpush3.msra.mxu1 %v988_v35 }
0x1038   :  { %1284 = vmatprep.subr.mxu1 %v987_v36 }
0x1039   :  { %1285 = vmatpush3.msra.mxu1 %v987_v36 }
0x103a   :  { %1286 = vmatprep.subr.mxu1 %v986_v37 }
0x103b   :  { %1287 = vmatpush3.msra.mxu1 %v986_v37 }
0x103c   :  { %1288 = vmatprep.subr.mxu1 %v985_v38 }
0x103d   :  { %1289 = vmatpush3.msra.mxu1 %v985_v38 }
0x10f6   :  { %v843_v62 = vpop.f32.mrf.mxu1 }
0x10f7   :  { %v847_v63 = vadd.f32 %v843_v62, %v774_v61 }
0x10f8   :  { %v1270_v0 = vpop.f32.mrf.mxu1 }
0x10f9   :  { %1348 = vtanh.f32 %v847_v63  ;;  %v1134_v2 = vmul.f32 -1.442695, %v847_v63 }
0x10fb   :  { %1350 = vpow2.f32 %v1134_v2 }
0x1106   :  { %v1349_v1 = vpop.eup %1348 }
0x1107   :  { %857 = vrot.lane.b32.xlu1 %v1349_v1, %s1410_s27 }
0x1108   :  { %v1351_v8 = vpop.eup %1350 }
0x1109   :  { %v851_v9 = vadd.f32 1.0, %v1351_v8 }
0x110b   :  { %1352 = vrcp.f32 %v851_v9 }
0x1118   :  { %v1353_v10 = vpop.eup %1352 }
0x1119   :  { %v855_v13 = vmul.f32 %v1353_v10, %v760_v55 }
0x1179   :  { %v858_v11 = vpop.permute.xlu1 %857 }
0x117a   :  { %v860_v12 = vmul.f32 %v1353_v10, %v858_v11 }
0x117c   :  { %862 = vrot.lane.b32.xlu0 %v860_v12, %s1411_s5 }
0x11ee   :  { %v863_v14 = vpop.permute.xlu0 %862 }
0x11ef   :  { %v865_v15 = vadd.f32 %v863_v14, %v855_v13 }
0x11f1   :  { %1354 = vtanh.f32 %v865_v15 }
0x11fe   :  { %v1355_v16 = vpop.eup %1354 }
0x11ff   :  { %868 = vrot.lane.b32.xlu1 %v1355_v16, %s1410_s27 }
0x1271   :  { %v869_v17 = vpop.permute.xlu1 %868 }
0x1272   :  { %v871_v18 = vmul.f32 %v1353_v10, %v869_v17 }
0x1274   :  { %873 = vrot.lane.b32.xlu0 %v871_v18, %s1411_s5 }
0x12e6   :  { %v874_v19 = vpop.permute.xlu0 %873 }
0x12e7   :  { %877 = vst.msk [vmem:[#allocation3 + $0xc] sm:$0x3] %vm246_vm4, %v874_v19  ;;  %1280 = vmatmul.mubr.msk.f32.vlgmr.msra.gmra.mxu0 %vm139_vm3, %v874_v19 }
0x13a7   :  { %v948_v21 = vpop.f32.mrf.mxu0 }
0x13a8   :  { %v952_v22 = vadd.f32 %v948_v21, %v879_v20 }
0x13a9   :  { %v1281_v23 = vpop.f32.mrf.mxu0 }
0x13aa   :  { %1356 = vtanh.f32 %v952_v22  ;;  %v1136_v25 = vmul.f32 -1.442695, %v952_v22 }
0x13ac   :  { %1358 = vpow2.f32 %v1136_v25 }
0x13b7   :  { %v1357_v24 = vpop.eup %1356 }
0x13b8   :  { %962 = vrot.lane.b32.xlu1 %v1357_v24, %s1410_s27 }
0x13b9   :  { %v1359_v26 = vpop.eup %1358 }
0x13ba   :  { %v956_v27 = vadd.f32 1.0, %v1359_v26 }
0x13bc   :  { %1360 = vrcp.f32 %v956_v27 }
0x13c9   :  { %v1361_v28 = vpop.eup %1360 }
0x13ca   :  { %v960_v31 = vmul.f32 %v1361_v28, %v865_v15 }
0x142a   :  { %v963_v29 = vpop.permute.xlu1 %962 }
0x142b   :  { %v965_v30 = vmul.f32 %v1361_v28, %v963_v29 }
0x142d   :  { %967 = vrot.lane.b32.xlu0 %v965_v30, %s1411_s5 }
0x149f   :  { %v968_v32 = vpop.permute.xlu0 %967 }
0x14a0   :  { %v970_v33 = vadd.f32 %v968_v32, %v960_v31 }
0x14a2   :  { %1362 = vtanh.f32 %v970_v33 }
0x14af   :  { %v1363_v34 = vpop.eup %1362 }
0x14b0   :  { %973 = vrot.lane.b32.xlu1 %v1363_v34, %s1410_s27 }
0x14b4   :  { %1081 = vrot.lane.b32.xlu1 %v970_v33, %s1412_s2 }
0x1522   :  { %v974_v39 = vpop.permute.xlu1 %973 }
0x1523   :  { %v976_v40 = vmul.f32 %v1361_v28, %v974_v39 }
0x1525   :  { %978 = vrot.lane.b32.xlu0 %v976_v40, %s1411_s5 }
0x1526   :  { %v1082_v41 = vpop.permute.xlu1 %1081 }
0x1527   :  { %1084 = vst.msk [vmem:[#allocation6] sm:$0x3] %vm246_vm4, %v1082_v41 }
0x1597   :  { %v979_v42 = vpop.permute.xlu0 %978 }
0x1598   :  { %982 = vst.msk [vmem:[#allocation3 + $0xe] sm:$0x3] %vm246_vm4, %v979_v42  ;;  %1079 = vst.msk [vmem:[#allocation4] sm:$0x3] %vm246_vm4, %v979_v42 }
0x159f   :  { %v984_v43 = vld [vmem:[#allocation3 + $0x8] sm:$0xff] }
0x15a0   :  { %1291 = vmatmul.mubr.msk.f32.vlgmr.msra.gmra.mxu1 %vm139_vm3, %v984_v43 }
0x15a1   :  { %1375 = shalt.err (!%p1372_p4)
}
0x15a2   :  { %1096 = dma.vmem_to_hbm [thread:$0]  %s1094_s18, 32, %s1681_s9, [#allocation5]  }
0x15a3   :  { %s1384_s22 = scalar_lea.vmem %s1104_s20, 32  ;;  %p1389_p6 = scmp.lt.s32.totalorder %s1104_s20, %s1104_s20 }
0x15a4   :  { %p1385_p5 = scmp.ne.s32.totalorder %s1104_s20, %s1384_s22  ;;  %p1390_p7 = scmp.lt.s32.totalorder %s1384_s22, %s1384_s22 }
0x15a6   :  { %p1391_p8 = por %p1390_p7, %p1389_p6 }
0x15a8   :  { %p1392_p9 = pnand %p1391_p8, %p1385_p5 }
0x15aa   :  { %1395 = shalt.err (!%p1392_p9)
}
0x15ab   :  { %1106 = dma.vmem_to_hbm [thread:$0]  %s1104_s20, 32, %s1682_s10, [#allocation7]   ;;  %v1137_v44 = vld [vmem:[%s1679_s7] ss:$0 sm:$0xff] }
0x1660   :  { %v1292_v45 = vpop.f32.mrf.mxu1 }
0x1661   :  { %v1074_v46 = vadd.f32 %v1292_v45, %v1137_v44 }
0x1662   :  { %v1068_v47 = vpop.f32.mrf.mxu1 }
0x1663   :  { %1078 = vst.msk [vmem:[%s1680_s8 + $0x8] sm:$0xff] %vm44_vm1, %v1074_v46  ;;  %v1069_v48 = vadd.f32 %v1137_v44, %v1068_v47 }
0x1665   :  { %1077 = vst.msk [vmem:[%s1680_s8] sm:$0xff] %vm44_vm1, %v1069_v48 }
0x1666   :  { %1404 = dma.done.wait [#allocation5], 32  }
0x1667   :  { %1405 = vsyncadd [#allocation5], 4294967264 }
0x1668   :  { %1406 = dma.done.wait [#allocation7], 32  }
0x1669   :  { %1407 = vsyncadd [#allocation7], 4294967264 }
0x166a   :  { %1115 = vsyncpa [#allocation5], 1 }
0x166b   :  { %1116 = vsyncpa [#allocation7], 1 }

</bundles_post_ra>
